<compile_context>
chip_gen: v5e
topology: v5e:2x2
jax: 0.10.0
libtpu: 0.0.40
codegen_flags: <defaults>
</compile_context>

<pallas_src>
import functools

import jax
import jax.numpy as jnp
from jax.experimental import pallas as pl
from jax.experimental.pallas import tpu as pltpu

EPS = 1e-5


def _round_up(x, m):
    return ((x + m - 1) // m) * m


# Packed-parameter slab row layout (see point_cloud_ae_forward):
#   0: bn1 gamma   1: bn1 beta
#   2: bn2 gamma   3: bn2 beta
#   4: bn3 gamma   5: bn3 beta
#   6: dec1 bias   7: dec2 bias   8: dec3 bias (padded to P3_pad)
_R_G1, _R_B1, _R_G2, _R_B2, _R_G3, _R_B3, _R_D1, _R_D2, _R_D3 = range(9)
_AUX_ROWS = 16  # padded to a sublane multiple


def _pcae_kernel(x_ref, w1_ref, w2_ref, w3_ref, wd1_ref, wd2_ref, wd3_ref,
                 aux_ref, out_ref, *, B, N, L, mm_dtype):
    M = B * N
    inv_m = 1.0 / float(M)

    def bn(h, g_row, b_row, relu):
        """Training-mode BatchNorm1d over the flattened (B*N, C) activations.

        Single fused pass: sum and sum-of-squares together; biased variance
        var = E[x^2] - mu^2 in f32 (magnitudes here are O(1), cancellation is
        benign)."""
        c = h.shape[1]
        mu = jnp.sum(h, axis=0, keepdims=True) * inv_m
        ex2 = jnp.sum(h * h, axis=0, keepdims=True) * inv_m
        var = ex2 - mu * mu
        gamma = aux_ref[g_row:g_row + 1, 0:c]
        beta = aux_ref[b_row:b_row + 1, 0:c]
        y = (h - mu) * (jax.lax.rsqrt(var + EPS) * gamma) + beta
        return jnp.maximum(y, 0.0) if relu else y

    # ---- encoder: Conv1d(kernel_size=1) == (B*N, Cin) @ (Cin, Cout) ----
    # Conv biases omitted: exactly cancelled by the BN mean subtraction.
    x = x_ref[...]                                                    # (M, 3)
    h = bn(jnp.dot(x, w1_ref[...], preferred_element_type=jnp.float32),
           _R_G1, _R_B1, relu=True)                                   # (M, 64)
    h = bn(jnp.dot(h.astype(mm_dtype), w2_ref[...],
                   preferred_element_type=jnp.float32),
           _R_G2, _R_B2, relu=True)                                   # (M, 128)
    h = bn(jnp.dot(h.astype(mm_dtype), w3_ref[...],
                   preferred_element_type=jnp.float32),
           _R_G3, _R_B3, relu=False)                                  # (M, L)

    # torch.max(x, 2)[0]: per-cloud max over the points axis.
    z = jnp.max(h.reshape(B, N, L), axis=1)                           # (B, L)

    # ---- decoder MLP ----
    d = jnp.maximum(
        jnp.dot(z.astype(mm_dtype), wd1_ref[...],
                preferred_element_type=jnp.float32)
        + aux_ref[_R_D1:_R_D1 + 1, 0:256], 0.0)                       # (B, 256)
    d = jnp.maximum(
        jnp.dot(d.astype(mm_dtype), wd2_ref[...],
                preferred_element_type=jnp.float32)
        + aux_ref[_R_D2:_R_D2 + 1, 0:256], 0.0)                       # (B, 256)
    d = (jnp.dot(d.astype(mm_dtype), wd3_ref[...],
                 preferred_element_type=jnp.float32)
         + aux_ref[_R_D3:_R_D3 + 1, 0:out_ref.shape[1]])              # (B, P3p)

    out_ref[...] = d.astype(out_ref.dtype)


def _vmem_budget_bytes(B, N, L, p3_pad, aux_cols):
    """Rough VMEM budget; clamp well under v7x's 64 MiB physical VMEM."""
    m = B * N
    act = m * (3 + 64 + 128 + L) * 4
    wts = (3 * 64 + 64 * 128 + 128 * L + L * 256 + 256 * 256
           + 256 * p3_pad) * 4
    aux = _AUX_ROWS * aux_cols * 4
    out = B * p3_pad * 4
    est = 4 * (act + wts + aux + out) + (8 << 20)
    return int(min(max(est, 32 << 20), 60 << 20))


def init_params(key, point_size, latent_size):
    """Deterministic synthetic parameters in kernel-friendly (in, out) layout."""
    ks = jax.random.split(key, 18)
    f32 = jnp.float32

    def rnd(k, shape, scale=0.1):
        return (scale * jax.random.normal(k, shape)).astype(f32)

    L, P3 = latent_size, point_size * 3
    return dict(
        w1=rnd(ks[0], (3, 64)),      b1=rnd(ks[1], (64,)),
        g1=1.0 + rnd(ks[2], (64,)),  be1=rnd(ks[3], (64,)),
        w2=rnd(ks[4], (64, 128)),    b2=rnd(ks[5], (128,)),
        g2=1.0 + rnd(ks[6], (128,)), be2=rnd(ks[7], (128,)),
        w3=rnd(ks[8], (128, L)),     b3=rnd(ks[9], (L,)),
        g3=1.0 + rnd(ks[10], (L,)),  be3=rnd(ks[11], (L,)),
        wd1=rnd(ks[12], (L, 256)),   bd1=rnd(ks[13], (256,)),
        wd2=rnd(ks[14], (256, 256)), bd2=rnd(ks[15], (256,)),
        wd3=rnd(ks[16], (256, P3)),  bd3=rnd(ks[17], (P3,)),
    )


def point_cloud_ae_forward(x_nc3w, params, point_size, latent_size,
                           *, matmul_dtype=jnp.float32):
    """x_nc3w: (B, 3, N) as in the PyTorch module. Returns (B, point_size, 3).

    matmul_dtype=jnp.bfloat16 casts MXU operands (weights here, activations
    inside the kernel) while keeping f32 accumulation and f32 BN/ReLU/max —
    recommended on v6e/v7x.
    """
    B, C, N = x_nc3w.shape
    assert C == 3
    P3 = point_size * 3
    P3_pad = _round_up(P3, 128)          # lane-dense output store
    aux_cols = max(256, P3_pad)
    mm = matmul_dtype

    # Flatten to (B*N, 3) so the whole encoder is plain 2-D matmuls.
    # TODO(synk): for large B*N, replace the single-shot launch with a
    # batch/points grid (BlockSpec tiling + double-buffered DMA), a cross-tile
    # sum/sumsq BN accumulator (BN stats span all tiles), and
    # dimension_semantics=("parallel", ...) so v7x's two TensorCores split the
    # work; at small VMEM-resident sizes single-shot is fastest.
    x_flat = jnp.transpose(x_nc3w, (0, 2, 1)).reshape(B * N, C).astype(mm)

    # Pad dec3 weight/bias columns to the lane-dense output width.
    wd3_pad = jnp.zeros((256, P3_pad), jnp.float32).at[:, :P3].set(params['wd3'])

    # One packed slab for every small per-channel parameter (single DMA).
    aux = jnp.zeros((_AUX_ROWS, aux_cols), jnp.float32)
    aux = aux.at[_R_G1, :64].set(params['g1']).at[_R_B1, :64].set(params['be1'])
    aux = aux.at[_R_G2, :128].set(params['g2']).at[_R_B2, :128].set(params['be2'])
    aux = aux.at[_R_G3, :latent_size].set(params['g3'])
    aux = aux.at[_R_B3, :latent_size].set(params['be3'])
    aux = aux.at[_R_D1, :256].set(params['bd1'])
    aux = aux.at[_R_D2, :256].set(params['bd2'])
    aux = aux.at[_R_D3, :P3].set(params['bd3'])

    weights = (params['w1'].astype(mm), params['w2'].astype(mm),
               params['w3'].astype(mm), params['wd1'].astype(mm),
               params['wd2'].astype(mm), wd3_pad.astype(mm))

    kernel = functools.partial(_pcae_kernel, B=B, N=N, L=latent_size,
                               mm_dtype=mm)
    vmem = pl.BlockSpec(memory_space=pltpu.MemorySpace.VMEM)
    out = pl.pallas_call(
        kernel,
        out_shape=jax.ShapeDtypeStruct((B, P3_pad), jnp.float32),
        in_specs=[vmem] * 8,
        out_specs=vmem,
        compiler_params=pltpu.CompilerParams(
            vmem_limit_bytes=_vmem_budget_bytes(B, N, latent_size, P3_pad,
                                                aux_cols)),
    )(x_flat, *weights, aux)

    return out[:, :P3].reshape(B, point_size, 3)


def _reference_forward(x_nc3w, params, point_size):
    """Pure-JAX f32 mirror of the PyTorch forward (training-mode BatchNorm,
    conv biases INCLUDED — the kernel drops them because BN cancels them)."""
    x = jnp.transpose(x_nc3w, (0, 2, 1)).astype(jnp.float32)   # (B, N, 3)

    def bn(h, g, b):
        mu = jnp.mean(h, axis=(0, 1), keepdims=True)
        var = jnp.mean((h - mu) ** 2, axis=(0, 1), keepdims=True)
        return (h - mu) / jnp.sqrt(var + EPS) * g + b

    h = jnp.maximum(bn(x @ params['w1'] + params['b1'],
                       params['g1'], params['be1']), 0.0)
    h = jnp.maximum(bn(h @ params['w2'] + params['b2'],
                       params['g2'], params['be2']), 0.0)
    h = bn(h @ params['w3'] + params['b3'], params['g3'], params['be3'])
    z = jnp.max(h, axis=1)
    d = jnp.maximum(z @ params['wd1'] + params['bd1'], 0.0)
    d = jnp.maximum(d @ params['wd2'] + params['bd2'], 0.0)
    d = d @ params['wd3'] + params['bd3']
    return d.reshape(-1, point_size, 3)


if __name__ == "__main__":
    point_size = 16     # points per cloud (encoder input N == decoder output)
    latent_size = 32
    B = 2

    key = jax.random.PRNGKey(0)
    k_x, k_p = jax.random.split(key)

    # Input matches the PyTorch module's expectation: (B, 3, N)
    x = jax.random.normal(k_x, (B, 3, point_size), dtype=jnp.float32)
    params = init_params(k_p, point_size, latent_size)

    ref = _reference_forward(x, params, point_size)

    # f32 path: tight correctness check against the PyTorch-faithful reference.
    out = point_cloud_ae_forward(x, params, point_size, latent_size)
    out = jax.block_until_ready(out)
    assert out.shape == (B, point_size, 3), out.shape
    err = float(jnp.max(jnp.abs(out - ref)))
    assert jnp.allclose(out, ref, atol=5e-4, rtol=5e-4), \
        f"f32 kernel mismatch vs reference: max abs err {err}"

    # bf16-MXU path (v6e/v7x optimization): loose sanity check vs f32 reference.
    out_bf16 = point_cloud_ae_forward(x, params, point_size, latent_size,
                                      matmul_dtype=jnp.bfloat16)
    out_bf16 = jax.block_until_ready(out_bf16)
    err16 = float(jnp.max(jnp.abs(out_bf16 - ref)))
    assert jnp.allclose(out_bf16, ref, atol=1e-1, rtol=1e-1), \
        f"bf16 kernel mismatch vs reference: max abs err {err16}"

    print("KERNEL_OK")
</pallas_src>

<mosaic_0001>
module attributes {stable_mosaic.version = 11 : i64} {
  func.func @_pcae_kernel(%arg0: memref<32x3xf32, #tpu.memory_space<vmem>>, %arg1: memref<3x64xf32, #tpu.memory_space<vmem>>, %arg2: memref<64x128xf32, #tpu.memory_space<vmem>>, %arg3: memref<128x32xf32, #tpu.memory_space<vmem>>, %arg4: memref<32x256xf32, #tpu.memory_space<vmem>>, %arg5: memref<256x256xf32, #tpu.memory_space<vmem>>, %arg6: memref<256x128xf32, #tpu.memory_space<vmem>>, %arg7: memref<16x256xf32, #tpu.memory_space<vmem>>, %arg8: memref<2x128xf32, #tpu.memory_space<vmem>>) attributes {dimension_semantics = [], scalar_prefetch = 0 : i64, scratch_operands = 0 : i64, tpu.core_type = #tpu.core_type<tc>} {
    %c0 = arith.constant 0 : index
    %c0_0 = arith.constant 0 : index
    %0 = vector.load %arg0[%c0, %c0_0] : memref<32x3xf32, #tpu.memory_space<vmem>>, vector<32x3xf32>
    %c0_1 = arith.constant 0 : index
    %c0_2 = arith.constant 0 : index
    %1 = vector.load %arg1[%c0_1, %c0_2] : memref<3x64xf32, #tpu.memory_space<vmem>>, vector<3x64xf32>
    %cst = arith.constant dense<0.000000e+00> : vector<32x64xf32>
    %2 = tpu.matmul %0, %1, %cst {dimension_numbers = #tpu.dot_dimension_numbers<[1], [0], [0], [1], [0, 0, 1, 1], [], []>} : vector<32x3xf32>, vector<3x64xf32>, vector<32x64xf32> -> vector<32x64xf32>
    %cst_3 = arith.constant dense<0.000000e+00> : vector<64xf32>
    %3 = vector.multi_reduction <add>, %2, %cst_3 [0] : vector<32x64xf32> to vector<64xf32>
    %4 = vector.shape_cast %3 : vector<64xf32> to vector<1x64xf32>
    %cst_4 = arith.constant 3.125000e-02 : f32
    %5 = vector.broadcast %cst_4 : f32 to vector<1x64xf32>
    %6 = arith.mulf %4, %5 : vector<1x64xf32>
    %7 = arith.mulf %2, %2 : vector<32x64xf32>
    %cst_5 = arith.constant dense<0.000000e+00> : vector<64xf32>
    %8 = vector.multi_reduction <add>, %7, %cst_5 [0] : vector<32x64xf32> to vector<64xf32>
    %9 = vector.shape_cast %8 : vector<64xf32> to vector<1x64xf32>
    %cst_6 = arith.constant 3.125000e-02 : f32
    %10 = vector.broadcast %cst_6 : f32 to vector<1x64xf32>
    %11 = arith.mulf %9, %10 : vector<1x64xf32>
    %12 = arith.mulf %6, %6 : vector<1x64xf32>
    %13 = arith.subf %11, %12 : vector<1x64xf32>
    %c0_7 = arith.constant 0 : index
    %c0_8 = arith.constant 0 : index
    %14 = vector.load %arg7[%c0_7, %c0_8] : memref<16x256xf32, #tpu.memory_space<vmem>>, vector<1x64xf32>
    %c1 = arith.constant 1 : index
    %c0_9 = arith.constant 0 : index
    %15 = vector.load %arg7[%c1, %c0_9] : memref<16x256xf32, #tpu.memory_space<vmem>>, vector<1x64xf32>
    %16 = vector.broadcast %6 : vector<1x64xf32> to vector<32x64xf32>
    %17 = arith.subf %2, %16 : vector<32x64xf32>
    %cst_10 = arith.constant 9.99999974E-6 : f32
    %18 = vector.broadcast %cst_10 : f32 to vector<1x64xf32>
    %19 = arith.addf %13, %18 : vector<1x64xf32>
    %20 = math.rsqrt %19 : vector<1x64xf32>
    %21 = arith.mulf %20, %14 : vector<1x64xf32>
    %22 = vector.broadcast %21 : vector<1x64xf32> to vector<32x64xf32>
    %23 = arith.mulf %17, %22 : vector<32x64xf32>
    %24 = vector.broadcast %15 : vector<1x64xf32> to vector<32x64xf32>
    %25 = arith.addf %23, %24 : vector<32x64xf32>
    %cst_11 = arith.constant 0.000000e+00 : f32
    %26 = vector.broadcast %cst_11 : f32 to vector<32x64xf32>
    %27 = arith.maximumf %25, %26 : vector<32x64xf32>
    %c0_12 = arith.constant 0 : index
    %c0_13 = arith.constant 0 : index
    %28 = vector.load %arg2[%c0_12, %c0_13] : memref<64x128xf32, #tpu.memory_space<vmem>>, vector<64x128xf32>
    %cst_14 = arith.constant dense<0.000000e+00> : vector<32x128xf32>
    %29 = tpu.matmul %27, %28, %cst_14 {dimension_numbers = #tpu.dot_dimension_numbers<[1], [0], [0], [1], [0, 0, 1, 1], [], []>} : vector<32x64xf32>, vector<64x128xf32>, vector<32x128xf32> -> vector<32x128xf32>
    %cst_15 = arith.constant dense<0.000000e+00> : vector<128xf32>
    %30 = vector.multi_reduction <add>, %29, %cst_15 [0] : vector<32x128xf32> to vector<128xf32>
    %31 = vector.shape_cast %30 : vector<128xf32> to vector<1x128xf32>
    %cst_16 = arith.constant 3.125000e-02 : f32
    %32 = vector.broadcast %cst_16 : f32 to vector<1x128xf32>
    %33 = arith.mulf %31, %32 : vector<1x128xf32>
    %34 = arith.mulf %29, %29 : vector<32x128xf32>
    %cst_17 = arith.constant dense<0.000000e+00> : vector<128xf32>
    %35 = vector.multi_reduction <add>, %34, %cst_17 [0] : vector<32x128xf32> to vector<128xf32>
    %36 = vector.shape_cast %35 : vector<128xf32> to vector<1x128xf32>
    %cst_18 = arith.constant 3.125000e-02 : f32
    %37 = vector.broadcast %cst_18 : f32 to vector<1x128xf32>
    %38 = arith.mulf %36, %37 : vector<1x128xf32>
    %39 = arith.mulf %33, %33 : vector<1x128xf32>
    %40 = arith.subf %38, %39 : vector<1x128xf32>
    %c2 = arith.constant 2 : index
    %c0_19 = arith.constant 0 : index
    %41 = vector.load %arg7[%c2, %c0_19] : memref<16x256xf32, #tpu.memory_space<vmem>>, vector<1x128xf32>
    %c3 = arith.constant 3 : index
    %c0_20 = arith.constant 0 : index
    %42 = vector.load %arg7[%c3, %c0_20] : memref<16x256xf32, #tpu.memory_space<vmem>>, vector<1x128xf32>
    %43 = vector.broadcast %33 : vector<1x128xf32> to vector<32x128xf32>
    %44 = arith.subf %29, %43 : vector<32x128xf32>
    %cst_21 = arith.constant 9.99999974E-6 : f32
    %45 = vector.broadcast %cst_21 : f32 to vector<1x128xf32>
    %46 = arith.addf %40, %45 : vector<1x128xf32>
    %47 = math.rsqrt %46 : vector<1x128xf32>
    %48 = arith.mulf %47, %41 : vector<1x128xf32>
    %49 = vector.broadcast %48 : vector<1x128xf32> to vector<32x128xf32>
    %50 = arith.mulf %44, %49 : vector<32x128xf32>
    %51 = vector.broadcast %42 : vector<1x128xf32> to vector<32x128xf32>
    %52 = arith.addf %50, %51 : vector<32x128xf32>
    %cst_22 = arith.constant 0.000000e+00 : f32
    %53 = vector.broadcast %cst_22 : f32 to vector<32x128xf32>
    %54 = arith.maximumf %52, %53 : vector<32x128xf32>
    %c0_23 = arith.constant 0 : index
    %c0_24 = arith.constant 0 : index
    %55 = vector.load %arg3[%c0_23, %c0_24] : memref<128x32xf32, #tpu.memory_space<vmem>>, vector<128x32xf32>
    %cst_25 = arith.constant dense<0.000000e+00> : vector<32x32xf32>
    %56 = tpu.matmul %54, %55, %cst_25 {dimension_numbers = #tpu.dot_dimension_numbers<[1], [0], [0], [1], [0, 0, 1, 1], [], []>} : vector<32x128xf32>, vector<128x32xf32>, vector<32x32xf32> -> vector<32x32xf32>
    %cst_26 = arith.constant dense<0.000000e+00> : vector<32xf32>
    %57 = vector.multi_reduction <add>, %56, %cst_26 [0] : vector<32x32xf32> to vector<32xf32>
    %58 = vector.shape_cast %57 : vector<32xf32> to vector<1x32xf32>
    %cst_27 = arith.constant 3.125000e-02 : f32
    %59 = vector.broadcast %cst_27 : f32 to vector<1x32xf32>
    %60 = arith.mulf %58, %59 : vector<1x32xf32>
    %61 = arith.mulf %56, %56 : vector<32x32xf32>
    %cst_28 = arith.constant dense<0.000000e+00> : vector<32xf32>
    %62 = vector.multi_reduction <add>, %61, %cst_28 [0] : vector<32x32xf32> to vector<32xf32>
    %63 = vector.shape_cast %62 : vector<32xf32> to vector<1x32xf32>
    %cst_29 = arith.constant 3.125000e-02 : f32
    %64 = vector.broadcast %cst_29 : f32 to vector<1x32xf32>
    %65 = arith.mulf %63, %64 : vector<1x32xf32>
    %66 = arith.mulf %60, %60 : vector<1x32xf32>
    %67 = arith.subf %65, %66 : vector<1x32xf32>
    %c4 = arith.constant 4 : index
    %c0_30 = arith.constant 0 : index
    %68 = vector.load %arg7[%c4, %c0_30] : memref<16x256xf32, #tpu.memory_space<vmem>>, vector<1x32xf32>
    %c5 = arith.constant 5 : index
    %c0_31 = arith.constant 0 : index
    %69 = vector.load %arg7[%c5, %c0_31] : memref<16x256xf32, #tpu.memory_space<vmem>>, vector<1x32xf32>
    %70 = vector.broadcast %60 : vector<1x32xf32> to vector<32x32xf32>
    %71 = arith.subf %56, %70 : vector<32x32xf32>
    %cst_32 = arith.constant 9.99999974E-6 : f32
    %72 = vector.broadcast %cst_32 : f32 to vector<1x32xf32>
    %73 = arith.addf %67, %72 : vector<1x32xf32>
    %74 = math.rsqrt %73 : vector<1x32xf32>
    %75 = arith.mulf %74, %68 : vector<1x32xf32>
    %76 = vector.broadcast %75 : vector<1x32xf32> to vector<32x32xf32>
    %77 = arith.mulf %71, %76 : vector<32x32xf32>
    %78 = vector.broadcast %69 : vector<1x32xf32> to vector<32x32xf32>
    %79 = arith.addf %77, %78 : vector<32x32xf32>
    %80 = vector.shape_cast %79 : vector<32x32xf32> to vector<2x16x32xf32>
    %cst_33 = arith.constant dense<0xFF800000> : vector<2x32xf32>
    %81 = vector.multi_reduction <maximumf>, %80, %cst_33 [1] : vector<2x16x32xf32> to vector<2x32xf32>
    %c0_34 = arith.constant 0 : index
    %c0_35 = arith.constant 0 : index
    %82 = vector.load %arg4[%c0_34, %c0_35] : memref<32x256xf32, #tpu.memory_space<vmem>>, vector<32x256xf32>
    %cst_36 = arith.constant dense<0.000000e+00> : vector<2x256xf32>
    %83 = tpu.matmul %81, %82, %cst_36 {dimension_numbers = #tpu.dot_dimension_numbers<[1], [0], [0], [1], [0, 0, 1, 1], [], []>} : vector<2x32xf32>, vector<32x256xf32>, vector<2x256xf32> -> vector<2x256xf32>
    %c6 = arith.constant 6 : index
    %c0_37 = arith.constant 0 : index
    %84 = vector.load %arg7[%c6, %c0_37] : memref<16x256xf32, #tpu.memory_space<vmem>>, vector<1x256xf32>
    %85 = vector.broadcast %84 : vector<1x256xf32> to vector<2x256xf32>
    %86 = arith.addf %83, %85 : vector<2x256xf32>
    %cst_38 = arith.constant 0.000000e+00 : f32
    %87 = vector.broadcast %cst_38 : f32 to vector<2x256xf32>
    %88 = arith.maximumf %86, %87 : vector<2x256xf32>
    %c0_39 = arith.constant 0 : index
    %c0_40 = arith.constant 0 : index
    %89 = vector.load %arg5[%c0_39, %c0_40] : memref<256x256xf32, #tpu.memory_space<vmem>>, vector<256x256xf32>
    %cst_41 = arith.constant dense<0.000000e+00> : vector<2x256xf32>
    %90 = tpu.matmul %88, %89, %cst_41 {dimension_numbers = #tpu.dot_dimension_numbers<[1], [0], [0], [1], [0, 0, 1, 1], [], []>} : vector<2x256xf32>, vector<256x256xf32>, vector<2x256xf32> -> vector<2x256xf32>
    %c7 = arith.constant 7 : index
    %c0_42 = arith.constant 0 : index
    %91 = vector.load %arg7[%c7, %c0_42] : memref<16x256xf32, #tpu.memory_space<vmem>>, vector<1x256xf32>
    %92 = vector.broadcast %91 : vector<1x256xf32> to vector<2x256xf32>
    %93 = arith.addf %90, %92 : vector<2x256xf32>
    %cst_43 = arith.constant 0.000000e+00 : f32
    %94 = vector.broadcast %cst_43 : f32 to vector<2x256xf32>
    %95 = arith.maximumf %93, %94 : vector<2x256xf32>
    %c0_44 = arith.constant 0 : index
    %c0_45 = arith.constant 0 : index
    %96 = vector.load %arg6[%c0_44, %c0_45] : memref<256x128xf32, #tpu.memory_space<vmem>>, vector<256x128xf32>
    %cst_46 = arith.constant dense<0.000000e+00> : vector<2x128xf32>
    %97 = tpu.matmul %95, %96, %cst_46 {dimension_numbers = #tpu.dot_dimension_numbers<[1], [0], [0], [1], [0, 0, 1, 1], [], []>} : vector<2x256xf32>, vector<256x128xf32>, vector<2x128xf32> -> vector<2x128xf32>
    %c8 = arith.constant 8 : index
    %c0_47 = arith.constant 0 : index
    %98 = vector.load %arg7[%c8, %c0_47] : memref<16x256xf32, #tpu.memory_space<vmem>>, vector<1x128xf32>
    %99 = vector.broadcast %98 : vector<1x128xf32> to vector<2x128xf32>
    %100 = arith.addf %97, %99 : vector<2x128xf32>
    %c0_48 = arith.constant 0 : index
    %c0_49 = arith.constant 0 : index
    %101 = vector.load %arg8[%c0_48, %c0_49] : memref<2x128xf32, #tpu.memory_space<vmem>>, vector<2x128xf32>
    tpu.vector_store %arg8[%c0_48, %c0_49], %100 {strides = array<i32>} : memref<2x128xf32, #tpu.memory_space<vmem>>, vector<2x128xf32>,
    return
  }
}

</mosaic_0001>

<bundles_post_ra>
// kernel: tpu_custom_call.1
= control target key start
LH: loop header
LB: loop body
LE: loop exit
PB: predicated region body
PF: predicated region fallthrough
CT: control target
= control target key end

     0   :  { %13 = vsyncpa [#allocation3], 0  ;;  %s1116_s0 = inlined_call_operand.vmem [shape: f32[32,3], index: 0, kind: input, shape index: {}]   ;;  %s1117_s1 = inlined_call_operand.vmem [shape: f32[3,64], index: 1, kind: input, shape index: {}]   ;;  %s1118_s2 = inlined_call_operand.vmem [shape: f32[64,128], index: 2, kind: input, shape index: {}]   ;;  %s1119_s3 = inlined_call_operand.vmem [shape: f32[128,32], index: 3, kind: input, shape index: {}]   ;;  %s1120_s4 = inlined_call_operand.vmem [shape: f32[32,256], index: 4, kind: input, shape index: {}]   ;;  %s1121_s5 = inlined_call_operand.hbm [shape: f32[256,256], index: 5, kind: input, shape index: {}]   ;;  %s1122_s6 = inlined_call_operand.hbm [shape: f32[256,128], index: 6, kind: input, shape index: {}]   ;;  %s1123_s7 = inlined_call_operand.vmem [shape: f32[16,256], index: 7, kind: input, shape index: {}]   ;;  %s1124_s8 = inlined_call_operand.hbm [shape: f32[2,128], index: 8, kind: output, shape index: {}]  }
   0x1   :  { %14 = vsyncpa [#allocation6], 0 }
   0x2   :  { %15 = vsyncpa [#allocation4], 0  ;;  %s30_s29 = sshll.u32 %s1121_s5, 4  ;;  %s819_s30 = smov [#allocation2]   ;;  %s31_s29 = int_to_ptr.hbm [resolvable:$true] %s30_s29 }
   0x3   :  { %s32_s9 = sshll.u32 %s819_s30, 4  ;;  %s43_s12 = sshll.u32 %s1122_s6, 4  ;;  %s33_s9 = int_to_ptr.vmem [resolvable:$true] %s32_s9  ;;  %s44_s12 = int_to_ptr.hbm [resolvable:$true] %s43_s12 }
   0x4   :  { %s820_s13 = smov 256   ;;  %s821_s14 = smov 16  }
   0x5   :  { %38 = dma.hbm_to_vmem [thread:$0]  %s31_s29, 8192, %s33_s9, [#allocation3], %s820_s13, %s820_s13, %s821_s14  }
   0x6   :  { %s822_s15 = smov [#allocation5]   ;;  %s823_s17 = smov 128  }
   0x7   :  { %s45_s16 = sshll.u32 %s822_s15, 4  ;;  %s824_s18 = smov 8   ;;  %s46_s16 = int_to_ptr.vmem [resolvable:$true] %s45_s16 }
   0x8   :  { %51 = dma.hbm_to_vmem [thread:$0]  %s44_s12, 4096, %s46_s16, [#allocation6], %s823_s17, %s823_s17, %s824_s18  }
   0x9   :  { %813 = dma.done.wait [#allocation3], 8192  }
   0xa   :  { %814 = vsyncadd [#allocation3], 4294959104 }
   0xb   :  { %815 = dma.done.wait [#allocation6], 4096  }
   0xc   :  { %816 = vsyncadd [#allocation6], 4294963200  ;;  %vm80_vm0 = vcmask 1042432   ;;  %vm67_vm1 = vcmask 23552   ;;  %v66_v0 = vld [vmem:[%s1117_s1] sm:$0x7] }
   0xd   :  { %v62_v1 = vld [vmem:[%s1116_s0] sm:$0xff]  ;;  %715 = vmatpush.msk.msra.mxu0 %vm80_vm0, %v66_v0  ;;  %v63_v2 = vld [vmem:[%s1116_s0 + $0x8] sm:$0xff]  ;;  %v64_v3 = vld [vmem:[%s1116_s0 + $0x10] sm:$0xff]  ;;  %vm113_vm2 = vcmask 523264   ;;  %vm328_vm9 = vcmask 261120   ;;  %vm424_vm13 = vcmask 1041409  }
   0xe   :  { %716 = vmatmul.msk.f32.vlgmr.msra.gmra.mxu0 %vm67_vm1, %v62_v1  ;;  %v65_v4 = vld [vmem:[%s1116_s0 + $0x18] sm:$0xff]  ;;  %v184_v29 = vld [vmem:[%s1118_s2 + $0x30] sm:$0xff]  ;;  %v183_v32 = vld [vmem:[%s1118_s2 + $0x28] sm:$0xff]  ;;  %s825_s26 = smov [#allocation7]   ;;  %s704_s27 = sshll.u32 %s1124_s8, 4  ;;  %s705_s27 = int_to_ptr.hbm [resolvable:$true] %s704_s27 }
   0xf   :  { %v185_v25 = vld [vmem:[%s1118_s2 + $0x38] sm:$0xff]  ;;  %v182_v35 = vld [vmem:[%s1118_s2 + $0x20] sm:$0xff]  ;;  %v180_v41 = vld [vmem:[%s1118_s2 + $0x10] sm:$0xff] }
  0x10   :  { %206 = vmatpush.msra.mxu1 %v185_v25  ;;  %v181_v38 = vld [vmem:[%s1118_s2 + $0x18] sm:$0xff]  ;;  %v179_v42 = vld [vmem:[%s1118_s2 + $0x8] sm:$0xff]  ;;  %v178_v45 = vld [vmem:[%s1118_s2] sm:$0xff] }
  0x11   :  { %v148_v57 = vld [vmem:[%s1123_s7] ss:$0 sm:$0xff]  ;;  %v149_v62 = vld [vmem:[%s1123_s7 + $0x1] ss:$0 sm:$0xff] }
  0x12   :  { %207 = vmatpush.msra.mxu1 %v184_v29 }
  0x14   :  { %208 = vmatpush.msra.mxu1 %v183_v32  ;;  %v290_v32 = vld [vmem:[%s1119_s3 + $0x38] sm:$0xff] }
  0x16   :  { %717 = vmatmul.msk.f32.gmra.mxu0 %vm67_vm1, %v63_v2  ;;  %209 = vmatpush.msra.mxu1 %v182_v35 }
  0x18   :  { %210 = vmatpush.msra.mxu1 %v181_v38 }
  0x1a   :  { %211 = vmatpush.msra.mxu1 %v180_v41 }
  0x1c   :  { %212 = vmatpush.msra.mxu1 %v179_v42  ;;  %v287_v42 = vld [vmem:[%s1119_s3 + $0x20] sm:$0xff] }
  0x1e   :  { %718 = vmatmul.msk.f32.gmra.mxu0 %vm67_vm1, %v64_v3  ;;  %213 = vmatpush.msra.mxu1 %v178_v45  ;;  %v286_v45 = vld [vmem:[%s1119_s3 + $0x18] sm:$0xff] }
  0x26   :  { %719 = vmatmul.msk.f32.gmra.mxu0 %vm67_vm1, %v65_v4 }
  0x8b   :  { %v892_v5 = vpop.f32.mrf.mxu0 }
  0x8c   :  { %v128_v9 = vmul.f32 %v892_v5, %v892_v5  ;;  %v114_v12 = vsel %vm113_vm2, %v892_v5, 0.0 }
  0x8e   :  { %v132_v16 = vsel %vm113_vm2, %v128_v9, 0.0 }
  0x93   :  { %v894_v6 = vpop.f32.mrf.mxu0 }
  0x94   :  { %v129_v8 = vmul.f32 %v894_v6, %v894_v6  ;;  %v115_v10 = vsel %vm113_vm2, %v894_v6, 0.0 }
  0x95   :  { %v116_v15 = vadd.f32 %v115_v10, %v114_v12 }
  0x96   :  { %v133_v13 = vsel %vm113_vm2, %v129_v8, 0.0 }
  0x97   :  { %v134_v18 = vadd.f32 %v133_v13, %v132_v16 }
  0x9b   :  { %v896_v7 = vpop.f32.mrf.mxu0 }
  0x9c   :  { %v130_v11 = vmul.f32 %v896_v7, %v896_v7  ;;  %v117_v14 = vsel %vm113_vm2, %v896_v7, 0.0 }
  0x9d   :  { %v118_v19 = vadd.f32 %v117_v14, %v116_v15 }
  0x9e   :  { %v135_v17 = vsel %vm113_vm2, %v130_v11, 0.0 }
  0x9f   :  { %v136_v23 = vadd.f32 %v135_v17, %v134_v18  ;;  %v297_v17 = vld [vmem:[%s1119_s3 + $0x70] sm:$0xff]  ;;  %v296_v18 = vld [vmem:[%s1119_s3 + $0x68] sm:$0xff] }
  0xa3   :  { %v913_v20 = vpop.f32.mrf.mxu0 }
  0xa4   :  { %v119_v21 = vsel %vm113_vm2, %v913_v20, 0.0  ;;  %v131_v22 = vmul.f32 %v913_v20, %v913_v20 }
  0xa5   :  { %v120_v24 = vadd.f32 %v119_v21, %v118_v19  ;;  %v294_v21 = vld [vmem:[%s1119_s3 + $0x58] sm:$0xff] }
  0xa6   :  { %v137_v26 = vsel %vm113_vm2, %v131_v22, 0.0 }
  0xa7   :  { %v121_v27 = vrot.slane %v120_v24, 4  ;;  %v138_v28 = vadd.f32 %v137_v26, %v136_v23  ;;  %v293_v23 = vld [vmem:[%s1119_s3 + $0x50] sm:$0xff] }
  0xa9   :  { %v122_v30 = vadd.f32 %v121_v27, %v120_v24  ;;  %v139_v31 = vrot.slane %v138_v28, 4  ;;  %v292_v27 = vld [vmem:[%s1119_s3 + $0x48] sm:$0xff] }
  0xab   :  { %v123_v33 = vrot.slane %v122_v30, 2  ;;  %v140_v34 = vadd.f32 %v139_v31, %v138_v28  ;;  %v291_v28 = vld [vmem:[%s1119_s3 + $0x40] sm:$0xff] }
  0xad   :  { %v124_v36 = vadd.f32 %v123_v33, %v122_v30  ;;  %v141_v37 = vrot.slane %v140_v34, 2 }
  0xaf   :  { %v125_v39 = vrot.slane %v124_v36, 1  ;;  %v142_v40 = vadd.f32 %v141_v37, %v140_v34 }
  0xb1   :  { %v126_v43 = vadd.f32 %v125_v39, %v124_v36  ;;  %v143_v44 = vrot.slane %v142_v40, 1  ;;  %v289_v36 = vld [vmem:[%s1119_s3 + $0x30] sm:$0xff]  ;;  %v288_v39 = vld [vmem:[%s1119_s3 + $0x28] sm:$0xff] }
  0xb3   :  { %v127_v46 = vmul.f32 0.03125, %v126_v43  ;;  %v144_v47 = vadd.f32 %v143_v44, %v142_v40 }
  0xb5   :  { %v145_v48 = vmul.f32 0.03125, %v144_v47  ;;  %v146_v49 = vmul.f32 %v127_v46, %v127_v46  ;;  %v150_v61 = vsub.f32 %v892_v5, %v127_v46  ;;  %v151_v1 = vsub.f32 %v894_v6, %v127_v46 }
  0xb6   :  { %v152_v8 = vsub.f32 %v896_v7, %v127_v46  ;;  %v153_v11 = vsub.f32 %v913_v20, %v127_v46  ;;  %v298_v7 = vld [vmem:[%s1119_s3 + $0x78] sm:$0xff]  ;;  %v295_v20 = vld [vmem:[%s1119_s3 + $0x60] sm:$0xff] }
  0xb7   :  { %v147_v50 = vsub.f32 %v145_v48, %v146_v49  ;;  %299 = vmatpush.msra.mxu2 %v298_v7  ;;  %v285_v48 = vld [vmem:[%s1119_s3 + $0x10] sm:$0xff] }
  0xb9   :  { %v154_v51 = vadd.f32 1e-05, %v147_v50  ;;  %300 = vmatpush.msra.mxu2 %v297_v17 }
  0xbb   :  { %735 = vrsqrt.f32 %v154_v51  ;;  %vm161_vm4 = vweird.f32 %v154_v51  ;;  %301 = vmatpush.msra.mxu2 %v296_v18 }
  0xbd   :  { %302 = vmatpush.msra.mxu2 %v295_v20 }
  0xbf   :  { %303 = vmatpush.msra.mxu2 %v294_v21 }
  0xc1   :  { %v736_v52 = vpop.eup %735  ;;  %304 = vmatpush.msra.mxu2 %v293_v23 }
  0xc2   :  { %v156_v53 = vmul.f32 %v736_v52, %v154_v51  ;;  %vm162_vm3 = vweird.f32 %v736_v52  ;;  %v284_v51 = vld [vmem:[%s1119_s3 + $0x8] sm:$0xff] }
  0xc3   :  { %vm163_vm5 = vmor %vm161_vm4, %vm162_vm3  ;;  %305 = vmatpush.msra.mxu2 %v292_v27 }
  0xc4   :  { %v157_v54 = vmul.f32 %v736_v52, %v156_v53 }
  0xc5   :  { %306 = vmatpush.msra.mxu2 %v291_v28 }
  0xc6   :  { %v158_v55 = vmul.f32 0.5, %v157_v54  ;;  %v283_v54 = vld [vmem:[%s1119_s3] sm:$0xff]  ;;  %s702_s3 = sshll.u32 %s825_s26, 4  ;;  %s703_s3 = int_to_ptr.vmem [resolvable:$true] %s702_s3 }
  0xc7   :  { %307 = vmatpush.msra.mxu2 %v290_v32 }
  0xc8   :  { %v159_v56 = vsub.f32 1.5, %v158_v55 }
  0xc9   :  { %308 = vmatpush.msra.mxu2 %v289_v36 }
  0xca   :  { %v160_v58 = vmul.f32 %v736_v52, %v159_v56 }
  0xcb   :  { %309 = vmatpush.msra.mxu2 %v288_v39 }
  0xcc   :  { %v164_v59 = vsel %vm163_vm5, %v736_v52, %v160_v58 }
  0xcd   :  { %v165_v60 = vmul.f32 %v164_v59, %v148_v57  ;;  %310 = vmatpush.msra.mxu2 %v287_v42 }
  0xcf   :  { %v166_v63 = vmul.f32 %v165_v60, %v150_v61  ;;  %v167_v3 = vmul.f32 %v165_v60, %v151_v1  ;;  %v168_v10 = vmul.f32 %v165_v60, %v152_v8  ;;  %v169_v12 = vmul.f32 %v165_v60, %v153_v11  ;;  %311 = vmatpush.msra.mxu2 %v286_v45 }
  0xd1   :  { %v170_v0 = vadd.f32 %v166_v63, %v149_v62  ;;  %v171_v4 = vadd.f32 %v167_v3, %v149_v62  ;;  %v172_v5 = vadd.f32 %v168_v10, %v149_v62  ;;  %v173_v14 = vadd.f32 %v169_v12, %v149_v62  ;;  %312 = vmatpush.msra.mxu2 %v285_v48  ;;  %v254_v10 = vld [vmem:[%s1123_s7 + $0x3] ss:$0 sm:$0xff] }
  0xd3   :  { %v174_v2 = vmax.f32 %v170_v0, 0.0  ;;  %v175_v9 = vmax.f32 %v171_v4, 0.0  ;;  %v176_v13 = vmax.f32 %v172_v5, 0.0  ;;  %v177_v6 = vmax.f32 %v173_v14, 0.0  ;;  %313 = vmatpush.msra.mxu2 %v284_v51 }
  0xd5   :  { %720 = vmatmul.msk.f32.vlgmr.msra.gmra.mxu1 %vm113_vm2, %v174_v2  ;;  %314 = vmatpush.msra.mxu2 %v283_v54  ;;  %v253_v2 = vld [vmem:[%s1123_s7 + $0x2] ss:$0 sm:$0xff] }
  0xdd   :  { %721 = vmatmul.msk.f32.gmra.mxu1 %vm113_vm2, %v175_v9 }
  0xe5   :  { %722 = vmatmul.msk.f32.gmra.mxu1 %vm113_vm2, %v176_v13 }
  0xed   :  { %723 = vmatmul.msk.f32.gmra.mxu1 %vm113_vm2, %v177_v6 }
 0x152   :  { %v958_v15 = vpop.f32.mrf.mxu1 }
 0x153   :  { %v237_v24 = vmul.f32 %v958_v15, %v958_v15 }
 0x15a   :  { %v960_v16 = vpop.f32.mrf.mxu1 }
 0x15b   :  { %v238_v22 = vmul.f32 %v960_v16, %v960_v16  ;;  %v227_v25 = vadd.f32 %v960_v16, %v958_v15 }
 0x15d   :  { %v241_v29 = vadd.f32 %v238_v22, %v237_v24 }
 0x162   :  { %v971_v19 = vpop.f32.mrf.mxu1 }
 0x163   :  { %v239_v26 = vmul.f32 %v971_v19, %v971_v19  ;;  %v228_v30 = vadd.f32 %v227_v25, %v971_v19 }
 0x165   :  { %v242_v33 = vadd.f32 %v241_v29, %v239_v26 }
 0x16a   :  { %v997_v31 = vpop.f32.mrf.mxu1 }
 0x16b   :  { %v229_v34 = vadd.f32 %v228_v30, %v997_v31  ;;  %v240_v35 = vmul.f32 %v997_v31, %v997_v31 }
 0x16d   :  { %v230_v37 = vrot.slane %v229_v34, 4  ;;  %v243_v38 = vadd.f32 %v242_v33, %v240_v35 }
 0x16f   :  { %v231_v40 = vadd.f32 %v230_v37, %v229_v34  ;;  %v244_v41 = vrot.slane %v243_v38, 4 }
 0x171   :  { %v232_v43 = vrot.slane %v231_v40, 2  ;;  %v245_v44 = vadd.f32 %v244_v41, %v243_v38 }
 0x173   :  { %v233_v46 = vadd.f32 %v232_v43, %v231_v40  ;;  %v246_v47 = vrot.slane %v245_v44, 2 }
 0x175   :  { %v234_v49 = vrot.slane %v233_v46, 1  ;;  %v247_v50 = vadd.f32 %v246_v47, %v245_v44 }
 0x177   :  { %v235_v52 = vadd.f32 %v234_v49, %v233_v46  ;;  %v248_v53 = vrot.slane %v247_v50, 1 }
 0x179   :  { %v236_v55 = vmul.f32 0.03125, %v235_v52  ;;  %v249_v56 = vadd.f32 %v248_v53, %v247_v50 }
 0x17b   :  { %v250_v57 = vmul.f32 0.03125, %v249_v56  ;;  %v251_v58 = vmul.f32 %v236_v55, %v236_v55  ;;  %v255_v8 = vsub.f32 %v958_v15, %v236_v55  ;;  %v256_v12 = vsub.f32 %v960_v16, %v236_v55 }
 0x17c   :  { %v257_v7 = vsub.f32 %v971_v19, %v236_v55  ;;  %v258_v15 = vsub.f32 %v997_v31, %v236_v55 }
 0x17d   :  { %v252_v59 = vsub.f32 %v250_v57, %v251_v58  ;;  %v413_v58 = vld [vmem:[%s1120_s4 + $0x30] sm:$0xff] }
 0x17e   :  { %440 = vmatpush.msra.mxu3 %v413_v58 }
 0x17f   :  { %v259_v60 = vadd.f32 1e-05, %v252_v59  ;;  %v411_v59 = vld [vmem:[%s1120_s4 + $0x20] sm:$0xff] }
 0x180   :  { %441 = vmatpush.msra.mxu3 %v411_v59  ;;  %v520_v59 = vld [vmem:[#allocation2 + $0x190] sm:$0xff] }
 0x181   :  { %737 = vrsqrt.f32 %v259_v60  ;;  %vm266_vm7 = vweird.f32 %v259_v60 }
 0x187   :  { %v738_v61 = vpop.eup %737 }
 0x188   :  { %v261_v62 = vmul.f32 %v738_v61, %v259_v60  ;;  %vm267_vm6 = vweird.f32 %v738_v61 }
 0x189   :  { %vm268_vm8 = vmor %vm266_vm7, %vm267_vm6 }
 0x18a   :  { %v262_v63 = vmul.f32 %v738_v61, %v261_v62  ;;  %v409_v62 = vld [vmem:[%s1120_s4 + $0x10] sm:$0xff] }
 0x18b   :  { %442 = vmatpush.msra.mxu3 %v409_v62 }
 0x18c   :  { %v263_v0 = vmul.f32 0.5, %v262_v63 }
 0x18e   :  { %v264_v1 = vsub.f32 1.5, %v263_v0  ;;  %v407_v0 = vld [vmem:[%s1120_s4] sm:$0xff] }
 0x18f   :  { %443 = vmatpush.msra.mxu3 %v407_v0  ;;  %v518_v0 = vld [vmem:[#allocation2 + $0x180] sm:$0xff] }
 0x190   :  { %v265_v3 = vmul.f32 %v738_v61, %v264_v1 }
 0x192   :  { %v269_v4 = vsel %vm268_vm8, %v738_v61, %v265_v3 }
 0x193   :  { %v270_v9 = vmul.f32 %v269_v4, %v253_v2  ;;  %v414_v4 = vld [vmem:[%s1120_s4 + $0x38] sm:$0xff] }
 0x194   :  { %460 = vmatpush.msrb.mxu3 %v414_v4 }
 0x195   :  { %v271_v5 = vmul.f32 %v270_v9, %v255_v8  ;;  %v272_v14 = vmul.f32 %v270_v9, %v256_v12  ;;  %v273_v18 = vmul.f32 %v270_v9, %v257_v7  ;;  %v274_v22 = vmul.f32 %v270_v9, %v258_v15  ;;  %v412_v8 = vld [vmem:[%s1120_s4 + $0x28] sm:$0xff]  ;;  %v498_v7 = vld [vmem:[#allocation2 + $0xe0] sm:$0xff] }
 0x196   :  { %461 = vmatpush.msrb.mxu3 %v412_v8  ;;  %v516_v8 = vld [vmem:[#allocation2 + $0x170] sm:$0xff] }
 0x197   :  { %v275_v11 = vadd.f32 %v271_v5, %v254_v10  ;;  %v276_v6 = vadd.f32 %v272_v14, %v254_v10  ;;  %v277_v20 = vadd.f32 %v273_v18, %v254_v10  ;;  %v278_v23 = vadd.f32 %v274_v22, %v254_v10  ;;  %v410_v10 = vld [vmem:[%s1120_s4 + $0x18] sm:$0xff] }
 0x198   :  { %462 = vmatpush.msrb.mxu3 %v410_v10  ;;  %v515_v10 = vld [vmem:[#allocation2 + $0x168] sm:$0xff] }
 0x199   :  { %v279_v13 = vmax.f32 %v275_v11, 0.0  ;;  %v280_v17 = vmax.f32 %v276_v6, 0.0  ;;  %v281_v21 = vmax.f32 %v277_v20, 0.0  ;;  %v282_v24 = vmax.f32 %v278_v23, 0.0  ;;  %v408_v11 = vld [vmem:[%s1120_s4 + $0x8] sm:$0xff]  ;;  %v500_v6 = vld [vmem:[#allocation2 + $0xf0] sm:$0xff] }
 0x19a   :  { %463 = vmatpush.msrb.mxu3 %v408_v11  ;;  %541 = vmatpush.msrb.mxu0 %v500_v6  ;;  %v496_v23 = vld [vmem:[#allocation2 + $0xd0] sm:$0xff]  ;;  %v501_v6 = vld [vmem:[#allocation2 + $0xf8] sm:$0xff] }
 0x19b   :  { %315 = vmatmul.f32.vlgmr.msra.gmra.mxu2 %v279_v13  ;;  %v363_v13 = vld [vmem:[%s1123_s7 + $0x4] ss:$0 sm:$0xff] }
 0x19c   :  { %542 = vmatpush.msrb.mxu0 %v498_v7  ;;  %v476_v7 = vld [vmem:[#allocation2 + $0x30] sm:$0xff] }
 0x19e   :  { %543 = vmatpush.msrb.mxu0 %v496_v23  ;;  %v489_v23 = vld [vmem:[#allocation2 + $0x98] sm:$0xff] }
 0x1a3   :  { %318 = vmatmul.f32.gmra.mxu2 %v280_v17 }
 0x1ab   :  { %321 = vmatmul.f32.gmra.mxu2 %v281_v21 }
 0x1b3   :  { %324 = vmatmul.f32.gmra.mxu2 %v282_v24  ;;  %v533_v24 = vld [vmem:[#allocation2 + $0x1f8] sm:$0xff] }
 0x1b4   :  { %601 = vmatpush.msrb.mxu2 %v533_v24  ;;  %v487_v24 = vld [vmem:[#allocation2 + $0x88] sm:$0xff] }
 0x21e   :  { %v1036_v25 = vpop.f32.mrf.mxu2 }
 0x21f   :  { %v343_v27 = vmul.f32 %v1036_v25, %v1036_v25  ;;  %v329_v30 = vsel %vm328_vm9, %v1036_v25, 0.0 }
 0x221   :  { %v347_v34 = vsel %vm328_vm9, %v343_v27, 0.0  ;;  %v532_v27 = vld [vmem:[#allocation2 + $0x1f0] sm:$0xff] }
 0x222   :  { %561 = vmatpush.msrb.mxu1 %v532_v27  ;;  %v483_v27 = vld [vmem:[#allocation2 + $0x68] sm:$0xff] }
 0x226   :  { %v1038_v16 = vpop.f32.mrf.mxu2 }
 0x227   :  { %v344_v19 = vmul.f32 %v1038_v16, %v1038_v16  ;;  %v330_v28 = vsel %vm328_vm9, %v1038_v16, 0.0 }
 0x228   :  { %v331_v33 = vadd.f32 %v330_v28, %v329_v30 }
 0x229   :  { %v348_v31 = vsel %vm328_vm9, %v344_v19, 0.0  ;;  %v364_v19 = vld [vmem:[%s1123_s7 + $0x5] ss:$0 sm:$0xff] }
 0x22a   :  { %v349_v36 = vadd.f32 %v348_v31, %v347_v34  ;;  %v494_v31 = vld [vmem:[#allocation2 + $0xc0] sm:$0xff] }
 0x22b   :  { %544 = vmatpush.msrb.mxu0 %v494_v31  ;;  %v514_v31 = vld [vmem:[#allocation2 + $0x160] sm:$0xff] }
 0x22e   :  { %v1040_v26 = vpop.f32.mrf.mxu2 }
 0x22f   :  { %v345_v29 = vmul.f32 %v1040_v26, %v1040_v26  ;;  %v332_v32 = vsel %vm328_vm9, %v1040_v26, 0.0 }
 0x230   :  { %v333_v37 = vadd.f32 %v332_v32, %v331_v33  ;;  %v531_v32 = vld [vmem:[#allocation2 + $0x1e8] sm:$0xff]  ;;  %v530_v33 = vld [vmem:[#allocation2 + $0x1e0] sm:$0xff] }
 0x231   :  { %v350_v35 = vsel %vm328_vm9, %v345_v29, 0.0  ;;  %602 = vmatpush.msrb.mxu2 %v531_v32  ;;  %562 = vmatpush.msrb.mxu1 %v530_v33  ;;  %v475_v32 = vld [vmem:[#allocation2 + $0x28] sm:$0xff]  ;;  %v513_v33 = vld [vmem:[#allocation2 + $0x158] sm:$0xff] }
 0x232   :  { %v351_v41 = vadd.f32 %v350_v35, %v349_v36 }
 0x236   :  { %v1057_v38 = vpop.f32.mrf.mxu2 }
 0x237   :  { %v334_v39 = vsel %vm328_vm9, %v1057_v38, 0.0  ;;  %v346_v40 = vmul.f32 %v1057_v38, %v1057_v38 }
 0x238   :  { %v335_v42 = vadd.f32 %v334_v39, %v333_v37  ;;  %v492_v37 = vld [vmem:[#allocation2 + $0xb0] sm:$0xff]  ;;  %v527_v39 = vld [vmem:[#allocation2 + $0x1c8] sm:$0xff] }
 0x239   :  { %v352_v43 = vsel %vm328_vm9, %v346_v40, 0.0  ;;  %v526_v40 = vld [vmem:[#allocation2 + $0x1c0] sm:$0xff]  ;;  %545 = vmatpush.msrb.mxu0 %v492_v37 }
 0x23a   :  { %v336_v44 = vrot.slane %v335_v42, 4  ;;  %v353_v45 = vadd.f32 %v352_v43, %v351_v41  ;;  %v510_v37 = vld [vmem:[#allocation2 + $0x140] sm:$0xff] }
 0x23c   :  { %v337_v46 = vadd.f32 %v336_v44, %v335_v42  ;;  %v354_v47 = vrot.slane %v353_v45, 4 }
 0x23e   :  { %v338_v48 = vrot.slane %v337_v46, 2  ;;  %v355_v49 = vadd.f32 %v354_v47, %v353_v45  ;;  %v490_v45 = vld [vmem:[#allocation2 + $0xa0] sm:$0xff] }
 0x23f   :  { %546 = vmatpush.msrb.mxu0 %v490_v45  ;;  %v503_v45 = vld [vmem:[#allocation2 + $0x108] sm:$0xff] }
 0x240   :  { %v339_v50 = vadd.f32 %v338_v48, %v337_v46  ;;  %v356_v51 = vrot.slane %v355_v49, 2  ;;  %v525_v46 = vld [vmem:[#allocation2 + $0x1b8] sm:$0xff] }
 0x242   :  { %v340_v52 = vrot.slane %v339_v50, 1  ;;  %v357_v53 = vadd.f32 %v356_v51, %v355_v49  ;;  %v524_v49 = vld [vmem:[#allocation2 + $0x1b0] sm:$0xff]  ;;  %v523_v51 = vld [vmem:[#allocation2 + $0x1a8] sm:$0xff] }
 0x244   :  { %v341_v54 = vadd.f32 %v340_v52, %v339_v50  ;;  %v358_v55 = vrot.slane %v357_v53, 1  ;;  %v488_v50 = vld [vmem:[#allocation2 + $0x90] sm:$0xff] }
 0x245   :  { %547 = vmatpush.msrb.mxu0 %v488_v50  ;;  %v636_v50 = vld [vmem:[#allocation5 + $0x68] sm:$0xff] }
 0x246   :  { %v342_v56 = vmul.f32 0.03125, %v341_v54  ;;  %v359_v57 = vadd.f32 %v358_v55, %v357_v53  ;;  %v522_v54 = vld [vmem:[#allocation2 + $0x1a0] sm:$0xff] }
 0x247   :  { %v486_v55 = vld [vmem:[#allocation2 + $0x80] sm:$0xff] }
 0x248   :  { %v360_v60 = vmul.f32 0.03125, %v359_v57  ;;  %v361_v61 = vmul.f32 %v342_v56, %v342_v56  ;;  %v367_v17 = vsub.f32 %v1040_v26, %v342_v56  ;;  %v368_v20 = vsub.f32 %v1057_v38, %v342_v56  ;;  %v528_v38 = vld [vmem:[#allocation2 + $0x1d0] sm:$0xff]  ;;  %548 = vmatpush.msrb.mxu0 %v486_v55  ;;  %v634_v55 = vld [vmem:[#allocation5 + $0x58] sm:$0xff] }
 0x249   :  { %v365_v21 = vsub.f32 %v1036_v25, %v342_v56  ;;  %v366_v22 = vsub.f32 %v1038_v16, %v342_v56  ;;  %v529_v25 = vld [vmem:[#allocation2 + $0x1d8] sm:$0xff]  ;;  %563 = vmatpush.msrb.mxu1 %v528_v38  ;;  %v471_v38 = vld [vmem:[#allocation2 + $0x8] sm:$0xff] }
 0x24a   :  { %v362_v63 = vsub.f32 %v360_v60, %v361_v61  ;;  %603 = vmatpush.msrb.mxu2 %v529_v25  ;;  %v521_v56 = vld [vmem:[#allocation2 + $0x198] sm:$0xff]  ;;  %v484_v60 = vld [vmem:[#allocation2 + $0x70] sm:$0xff]  ;;  %v519_v61 = vld [vmem:[#allocation2 + $0x188] sm:$0xff] }
 0x24b   :  { %564 = vmatpush.msrb.mxu1 %v526_v40  ;;  %549 = vmatpush.msrb.mxu0 %v484_v60  ;;  %v472_v25 = vld [vmem:[#allocation2 + $0x10] sm:$0xff]  ;;  %v631_v60 = vld [vmem:[#allocation5 + $0x40] sm:$0xff] }
 0x24c   :  { %v369_v1 = vadd.f32 1e-05, %v362_v63  ;;  %604 = vmatpush.msrb.mxu2 %v527_v39  ;;  %v509_v39 = vld [vmem:[#allocation2 + $0x138] sm:$0xff]  ;;  %v508_v40 = vld [vmem:[#allocation2 + $0x130] sm:$0xff] }
 0x24d   :  { %565 = vmatpush.msrb.mxu1 %v524_v49  ;;  %v654_v49 = vld [vmem:[#allocation5 + $0xf8] sm:$0xff] }
 0x24e   :  { %739 = vrsqrt.f32 %v369_v1  ;;  %vm376_vm11 = vweird.f32 %v369_v1  ;;  %605 = vmatpush.msrb.mxu2 %v525_v46  ;;  %v502_v46 = vld [vmem:[#allocation2 + $0x100] sm:$0xff] }
 0x24f   :  { %566 = vmatpush.msrb.mxu1 %v522_v54  ;;  %v651_v54 = vld [vmem:[#allocation5 + $0xe0] sm:$0xff] }
 0x250   :  { %606 = vmatpush.msrb.mxu2 %v523_v51  ;;  %v653_v51 = vld [vmem:[#allocation5 + $0xf0] sm:$0xff] }
 0x251   :  { %567 = vmatpush.msrb.mxu1 %v520_v59  ;;  %v632_v59 = vld [vmem:[#allocation5 + $0x48] sm:$0xff] }
 0x252   :  { %607 = vmatpush.msrb.mxu2 %v521_v56  ;;  %v650_v56 = vld [vmem:[#allocation5 + $0xd8] sm:$0xff] }
 0x253   :  { %568 = vmatpush.msrb.mxu1 %v518_v0 }
 0x254   :  { %v740_v2 = vpop.eup %739  ;;  %608 = vmatpush.msrb.mxu2 %v519_v61  ;;  %v724_v61 = vld [vmem:[%s1123_s7 + $0x6] ss:$8 sm:$0x3] }
 0x255   :  { %v371_v3 = vmul.f32 %v740_v2, %v369_v1  ;;  %vm377_vm10 = vweird.f32 %v740_v2  ;;  %v482_v1 = vld [vmem:[#allocation2 + $0x60] sm:$0xff]  ;;  %569 = vmatpush.msrb.mxu1 %v516_v8 }
 0x256   :  { %vm378_vm12 = vmor %vm376_vm11, %vm377_vm10  ;;  %550 = vmatpush.msrb.mxu0 %v482_v1 }
 0x257   :  { %v372_v9 = vmul.f32 %v740_v2, %v371_v3  ;;  %570 = vmatpush.msrb.mxu1 %v514_v31 }
 0x259   :  { %v373_v5 = vmul.f32 0.5, %v372_v9  ;;  %v480_v9 = vld [vmem:[#allocation2 + $0x50] sm:$0xff] }
 0x25a   :  { %551 = vmatpush.msrb.mxu0 %v480_v9 }
 0x25b   :  { %v374_v12 = vsub.f32 1.5, %v373_v5 }
 0x25d   :  { %v375_v14 = vmul.f32 %v740_v2, %v374_v12  ;;  %v478_v12 = vld [vmem:[#allocation2 + $0x40] sm:$0xff] }
 0x25e   :  { %552 = vmatpush.msrb.mxu0 %v478_v12  ;;  %v647_v12 = vld [vmem:[#allocation5 + $0xc0] sm:$0xff] }
 0x25f   :  { %v379_v18 = vsel %vm378_vm12, %v740_v2, %v375_v14  ;;  %v517_v2 = vld [vmem:[#allocation2 + $0x178] sm:$0xff] }
 0x260   :  { %v380_v15 = vmul.f32 %v379_v18, %v363_v13  ;;  %609 = vmatpush.msrb.mxu2 %v517_v2  ;;  %v499_v18 = vld [vmem:[#allocation2 + $0xe8] sm:$0xff]  ;;  %553 = vmatpush.msrb.mxu0 %v476_v7  ;;  %v645_v7 = vld [vmem:[#allocation5 + $0xb0] sm:$0xff] }
 0x262   :  { %v383_v28 = vmul.f32 %v380_v15, %v367_v17  ;;  %v384_v26 = vmul.f32 %v380_v15, %v368_v20  ;;  %v381_v29 = vmul.f32 %v380_v15, %v365_v21  ;;  %v382_v30 = vmul.f32 %v380_v15, %v366_v22  ;;  %610 = vmatpush.msrb.mxu2 %v515_v10  ;;  %v497_v20 = vld [vmem:[#allocation2 + $0xd8] sm:$0xff]  ;;  %v495_v15 = vld [vmem:[#allocation2 + $0xc8] sm:$0xff]  ;;  %v629_v10 = vld [vmem:[#allocation5 + $0x30] sm:$0xff] }
 0x263   :  { %v493_v21 = vld [vmem:[#allocation2 + $0xb8] sm:$0xff]  ;;  %v491_v22 = vld [vmem:[#allocation2 + $0xa8] sm:$0xff] }
 0x264   :  { %v387_v16 = vadd.f32 %v383_v28, %v364_v19  ;;  %v388_v34 = vadd.f32 %v384_v26, %v364_v19  ;;  %v385_v35 = vadd.f32 %v381_v29, %v364_v19  ;;  %v386_v36 = vadd.f32 %v382_v30, %v364_v19  ;;  %v485_v19 = vld [vmem:[#allocation2 + $0x78] sm:$0xff]  ;;  %v479_v26 = vld [vmem:[#allocation2 + $0x48] sm:$0xff]  ;;  %v474_v30 = vld [vmem:[#allocation2 + $0x20] sm:$0xff]  ;;  %611 = vmatpush.msrb.mxu2 %v513_v33 }
 0x265   :  { %v481_v28 = vld [vmem:[#allocation2 + $0x58] sm:$0xff]  ;;  %554 = vmatpush.msrb.mxu0 %v474_v30 }
 0x266   :  { %v398_v41 = vsel %vm328_vm9, %v387_v16, -inf  ;;  %v399_v42 = vsel %vm328_vm9, %v388_v34, -inf  ;;  %v389_v43 = vsel %vm328_vm9, %v385_v35, -inf  ;;  %v390_v44 = vsel %vm328_vm9, %v386_v36, -inf  ;;  %v477_v29 = vld [vmem:[#allocation2 + $0x38] sm:$0xff]  ;;  %v512_v16 = vld [vmem:[#allocation2 + $0x150] sm:$0xff] }
 0x267   :  { %v400_v47 = vmax.f32 %v398_v41, %v399_v42  ;;  %v391_v48 = vmax.f32 %v389_v43, %v390_v44  ;;  %555 = vmatpush.msrb.mxu0 %v472_v25  ;;  %v473_v34 = vld [vmem:[#allocation2 + $0x18] sm:$0xff]  ;;  %v511_v35 = vld [vmem:[#allocation2 + $0x148] sm:$0xff]  ;;  %v470_v36 = vld [vmem:[#allocation2] sm:$0xff]  ;;  %571 = vmatpush.msrb.mxu1 %v512_v16 }
 0x268   :  { %612 = vmatpush.msrb.mxu2 %v511_v35  ;;  %v507_v41 = vld [vmem:[#allocation2 + $0x128] sm:$0xff]  ;;  %v506_v42 = vld [vmem:[#allocation2 + $0x120] sm:$0xff]  ;;  %v505_v43 = vld [vmem:[#allocation2 + $0x118] sm:$0xff] }
 0x269   :  { %v392_v52 = vrot.slane %v391_v48, 4  ;;  %v401_v53 = vrot.slane %v400_v47, 4  ;;  %556 = vmatpush.msrb.mxu0 %v470_v36  ;;  %572 = vmatpush.msrb.mxu1 %v510_v37  ;;  %v504_v44 = vld [vmem:[#allocation2 + $0x110] sm:$0xff] }
 0x26a   :  { %613 = vmatpush.msrb.mxu2 %v509_v39  ;;  %v655_v37 = vld [vmem:[%s1123_s7 + $0x10] ss:$0 sm:$0xff] }
 0x26b   :  { %v393_v57 = vmax.f32 %v391_v48, %v392_v52  ;;  %v402_v58 = vmax.f32 %v400_v47, %v401_v53  ;;  %573 = vmatpush.msrb.mxu1 %v508_v40  ;;  %v638_v47 = vld [vmem:[#allocation5 + $0x78] sm:$0xff]  ;;  %v637_v48 = vld [vmem:[#allocation5 + $0x70] sm:$0xff]  ;;  %v652_v52 = vld [vmem:[#allocation5 + $0xe8] sm:$0xff] }
 0x26c   :  { %614 = vmatpush.msrb.mxu2 %v507_v41  ;;  %656 = vmatpush.msra.mxu0 %v638_v47  ;;  %v635_v53 = vld [vmem:[#allocation5 + $0x60] sm:$0xff] }
 0x26d   :  { %v394_v62 = vrot.slane %v393_v57, 2  ;;  %v403_v63 = vrot.slane %v402_v58, 2  ;;  %574 = vmatpush.msrb.mxu1 %v506_v42 }
 0x26e   :  { %615 = vmatpush.msrb.mxu2 %v505_v43  ;;  %657 = vmatpush.msra.mxu0 %v637_v48 }
 0x26f   :  { %v395_v3 = vmax.f32 %v393_v57, %v394_v62  ;;  %v404_v4 = vmax.f32 %v402_v58, %v403_v63  ;;  %575 = vmatpush.msrb.mxu1 %v504_v44  ;;  %v633_v57 = vld [vmem:[#allocation5 + $0x50] sm:$0xff]  ;;  %v630_v62 = vld [vmem:[#allocation5 + $0x38] sm:$0xff]  ;;  %v418_v63 = vperm.slane %v724_v61, 0 }
 0x270   :  { %616 = vmatpush.msrb.mxu2 %v503_v45  ;;  %658 = vmatpush.msra.mxu0 %v636_v50  ;;  %v649_v58 = vld [vmem:[#allocation5 + $0xd0] sm:$0xff] }
 0x271   :  { %v396_v5 = vrot.slane %v395_v3, 1  ;;  %v405_v11 = vrot.slane %v404_v4, 1  ;;  %576 = vmatpush.msrb.mxu1 %v502_v46 }
 0x272   :  { %659 = vmatpush.msra.mxu0 %v635_v53 }
 0x273   :  { %v397_v13 = vmax.f32 %v395_v3, %v396_v5  ;;  %v406_v14 = vmax.f32 %v404_v4, %v405_v11  ;;  %676 = vmatpush.msra.mxu1 %v654_v49  ;;  %v419_v3 = vperm.slane %v724_v61, 1  ;;  %v648_v5 = vld [vmem:[#allocation5 + $0xc8] sm:$0xff] }
 0x274   :  { %660 = vmatpush.msra.mxu0 %v634_v55  ;;  %v628_v11 = vld [vmem:[#allocation5 + $0x28] sm:$0xff] }
 0x275   :  { %v425_v17 = vsel %vm424_vm13, %v406_v14, %v397_v13  ;;  %677 = vmatpush.msra.mxu1 %v653_v51  ;;  %v627_v13 = vld [vmem:[#allocation5 + $0x20] sm:$0xff]  ;;  %v646_v14 = vld [vmem:[#allocation5 + $0xb8] sm:$0xff] }
 0x276   :  { %725 = vmatmul.msk.f32.vlgmr.msra.gmra.mxu3 %vm328_vm9, %v425_v17  ;;  %661 = vmatpush.msra.mxu0 %v633_v57 }
 0x277   :  { %581 = vmatpush.msra.mxu3 %v501_v6  ;;  %678 = vmatpush.msra.mxu1 %v652_v52  ;;  %v626_v6 = vld [vmem:[#allocation5 + $0x18] sm:$0xff] }
 0x278   :  { %662 = vmatpush.msra.mxu0 %v632_v59 }
 0x279   :  { %582 = vmatpush.msra.mxu3 %v499_v18  ;;  %679 = vmatpush.msra.mxu1 %v651_v54  ;;  %v644_v18 = vld [vmem:[#allocation5 + $0xa8] sm:$0xff] }
 0x27a   :  { %663 = vmatpush.msra.mxu0 %v631_v60 }
 0x27b   :  { %583 = vmatpush.msra.mxu3 %v497_v20  ;;  %680 = vmatpush.msra.mxu1 %v650_v56  ;;  %v624_v20 = vld [vmem:[#allocation5 + $0x8] sm:$0xff] }
 0x27c   :  { %664 = vmatpush.msra.mxu0 %v630_v62 }
 0x27d   :  { %584 = vmatpush.msra.mxu3 %v495_v15  ;;  %681 = vmatpush.msra.mxu1 %v649_v58  ;;  %v643_v15 = vld [vmem:[#allocation5 + $0xa0] sm:$0xff] }
 0x27e   :  { %726 = vmatmul.msk.f32.vlgmr.msrb.gmra.mxu3 %vm328_vm9, %v425_v17  ;;  %665 = vmatpush.msra.mxu0 %v629_v10  ;;  %v625_v17 = vld [vmem:[#allocation5 + $0x10] sm:$0xff] }
 0x27f   :  { %585 = vmatpush.msra.mxu3 %v493_v21  ;;  %682 = vmatpush.msra.mxu1 %v648_v5  ;;  %v623_v21 = vld [vmem:[#allocation5] sm:$0xff] }
 0x280   :  { %666 = vmatpush.msra.mxu0 %v628_v11 }
 0x281   :  { %586 = vmatpush.msra.mxu3 %v491_v22  ;;  %683 = vmatpush.msra.mxu1 %v647_v12  ;;  %v642_v22 = vld [vmem:[#allocation5 + $0x98] sm:$0xff] }
 0x282   :  { %667 = vmatpush.msra.mxu0 %v627_v13 }
 0x283   :  { %587 = vmatpush.msra.mxu3 %v489_v23  ;;  %684 = vmatpush.msra.mxu1 %v646_v14  ;;  %v641_v23 = vld [vmem:[#allocation5 + $0x90] sm:$0xff] }
 0x284   :  { %668 = vmatpush.msra.mxu0 %v626_v6 }
 0x285   :  { %588 = vmatpush.msra.mxu3 %v487_v24  ;;  %685 = vmatpush.msra.mxu1 %v645_v7  ;;  %v640_v24 = vld [vmem:[#allocation5 + $0x88] sm:$0xff] }
 0x286   :  { %669 = vmatpush.msra.mxu0 %v625_v17 }
 0x287   :  { %589 = vmatpush.msra.mxu3 %v485_v19  ;;  %686 = vmatpush.msra.mxu1 %v644_v18  ;;  %v639_v19 = vld [vmem:[#allocation5 + $0x80] sm:$0xff] }
 0x288   :  { %670 = vmatpush.msra.mxu0 %v624_v20 }
 0x289   :  { %590 = vmatpush.msra.mxu3 %v483_v27  ;;  %687 = vmatpush.msra.mxu1 %v643_v15  ;;  %v727_v27 = vld [vmem:[%s1123_s7 + $0x7] ss:$8 sm:$0x3] }
 0x28a   :  { %671 = vmatpush.msra.mxu0 %v623_v21  ;;  %v538_v31 = vperm.slane %v727_v27, 1 }
 0x28b   :  { %591 = vmatpush.msra.mxu3 %v481_v28  ;;  %688 = vmatpush.msra.mxu1 %v642_v22  ;;  %v537_v28 = vperm.slane %v727_v27, 0 }
 0x28d   :  { %592 = vmatpush.msra.mxu3 %v479_v26  ;;  %689 = vmatpush.msra.mxu1 %v641_v23 }
 0x28f   :  { %593 = vmatpush.msra.mxu3 %v477_v29  ;;  %690 = vmatpush.msra.mxu1 %v640_v24 }
 0x291   :  { %594 = vmatpush.msra.mxu3 %v475_v32  ;;  %691 = vmatpush.msra.mxu1 %v639_v19 }
 0x293   :  { %595 = vmatpush.msra.mxu3 %v473_v34 }
 0x295   :  { %596 = vmatpush.msra.mxu3 %v471_v38 }
 0x2f9   :  { %v445_v0 = vpop.f32.mrf.mxu3 }
 0x2fa   :  { %v446_v1 = vadd.f32 %v445_v0, %v418_v63 }
 0x2fc   :  { %v468_v2 = vmax.f32 %v446_v1, 0.0 }
 0x2fe   :  { %557 = vmatmul.f32.vlgmr.msrb.gmra.mxu0 %v468_v2  ;;  %597 = vmatmul.f32.vlgmr.msra.gmra.mxu3 %v468_v2 }
 0x301   :  { %v465_v4 = vpop.f32.mrf.mxu3 }
 0x302   :  { %v466_v8 = vadd.f32 %v465_v4, %v419_v3 }
 0x304   :  { %v469_v9 = vmax.f32 %v466_v8, 0.0 }
 0x306   :  { %577 = vmatmul.f32.vlgmr.msrb.gmra.mxu1 %v469_v9  ;;  %617 = vmatmul.f32.vlgmr.msrb.gmra.mxu2 %v469_v9 }
 0x37b   :  { %v558_v26 = vpop.f32.mrf.mxu0 }
 0x37c   :  { %v559_v29 = vadd.f32 %v558_v26, %v537_v28 }
 0x381   :  { %v598_v33 = vpop.f32.mrf.mxu3 }
 0x382   :  { %v599_v16 = vadd.f32 %v598_v33, %v538_v31 }
 0x383   :  { %v578_v30 = vpop.f32.mrf.mxu1 }
 0x384   :  { %v579_v32 = vadd.f32 %v578_v30, %v559_v29 }
 0x386   :  { %v621_v25 = vmax.f32 %v579_v32, 0.0 }
 0x388   :  { %672 = vmatmul.f32.vlgmr.msra.gmra.mxu0 %v621_v25 }
 0x389   :  { %v618_v34 = vpop.f32.mrf.mxu2 }
 0x38a   :  { %v619_v35 = vadd.f32 %v618_v34, %v599_v16 }
 0x38c   :  { %v622_v36 = vmax.f32 %v619_v35, 0.0 }
 0x38e   :  { %692 = vmatmul.f32.vlgmr.msra.gmra.mxu1 %v622_v36 }
 0x405   :  { %v673_v38 = vpop.f32.mrf.mxu0 }
 0x406   :  { %v674_v39 = vadd.f32 %v673_v38, %v655_v37 }
 0x40b   :  { %v693_v40 = vpop.f32.mrf.mxu1 }
 0x40c   :  { %v694_v41 = vadd.f32 %v693_v40, %v674_v39 }
 0x40e   :  { %696 = vst [vmem:[#allocation7] sm:$0x3] %v694_v41 }
 0x40f   :  { %707 = dma.vmem_to_hbm [thread:$0]  %s703_s3, 32, %s705_s27, [#allocation4]  }
 0x410   :  { %817 = dma.done.wait [#allocation4], 32  }
 0x411   :  { %818 = vsyncadd [#allocation4], 4294967264 }
 0x412   :  { %712 = vsyncpa [#allocation3], 1 }
 0x413   :  { %713 = vsyncpa [#allocation6], 1 }
 0x414   :  { %714 = vsyncpa [#allocation4], 1 }

</bundles_post_ra>
